<compile_context>
chip_gen: v6e
topology: v6e:2x2x1
jax: 0.10.0
libtpu: 0.0.40
codegen_flags: <defaults>
</compile_context>

<pallas_src>
import functools

import jax
import jax.numpy as jnp
import numpy as np
from jax.experimental import pallas as pl
from jax.experimental.pallas import tpu as pltpu


def _sobel_kernel(x_ref, o_ref, sx_hal, sy_hal, *, h, w, pad_lanes):
    """x_ref / o_ref: (1, B, L) -- B flattened (H, W) planes, L = padded H*W.

    sx_hal / sy_hal: (B, L + 2*w) VMEM scratch with a zero halo of one image
    row on each side; the vertical 3-tap pass reads overlapping windows of it.
    """
    hw = h * w
    x = x_ref[0]                       # (B, L) float32
    L = x.shape[1]

    # Border masks (computed once per block). Bit-AND instead of modulo when
    # the image width is a power of two.
    flat = jax.lax.broadcasted_iota(jnp.int32, x.shape, 1)
    col = (flat & (w - 1)) if (w & (w - 1)) == 0 else (flat % w)
    left_edge = col == 0
    right_edge = col == (w - 1)

    def lane_roll(v, shift):
        # jnp.roll semantics along the flattened lane axis (XLU rotation).
        return pltpu.roll(v, shift % L, axis=1)

    # Horizontal neighbors (zeros outside the image: padding=1 with zeros).
    x_rt = jnp.where(right_edge, 0.0, lane_roll(x, -1))   # x[i, j + 1]
    x_lf = jnp.where(left_edge, 0.0, lane_roll(x, 1))      # x[i, j - 1]

    # Separable Sobel: horizontal pass.
    sx = x_rt - x_lf                   # horizontal difference
    sy = x_lf + 2.0 * x + x_rt         # horizontal smoothing

    if pad_lanes:
        # Lane padding beyond the real plane must read as zero from below.
        valid = flat < hw
        sx = jnp.where(valid, sx, 0.0)
        sy = jnp.where(valid, sy, 0.0)

    # Zero the halos once; scratch persists across grid steps and only the
    # middle [w, w+L) window is rewritten each step.
    @pl.when(pl.program_id(0) == 0)
    def _():
        sx_hal[...] = jnp.zeros_like(sx_hal)
        sy_hal[...] = jnp.zeros_like(sy_hal)

    sx_hal[:, w:w + L] = sx
    sy_hal[:, w:w + L] = sy

    # Vertical pass: static overlapping lane-offset windows replace the
    # previous +/-w rolls and their border selects.
    above_x = sx_hal[:, 0:L]           # sx[i - 1, j]  (zero at row 0)
    below_x = sx_hal[:, 2 * w:2 * w + L]   # sx[i + 1, j]  (zero at row h-1)
    above_y = sy_hal[:, 0:L]
    below_y = sy_hal[:, 2 * w:2 * w + L]

    gx = above_x + 2.0 * sx + below_x
    gy = below_y - above_y

    o_ref[0] = jnp.sqrt(gx * gx + gy * gy + 1e-6)


def _round_up(x, m):
    return (x + m - 1) // m * m


def _pick_batch(nc, lane_bytes, budget_bytes):
    """Largest multiple-of-8 divisor of nc whose input block fits the budget.

    nc is already padded to a multiple of 8, so 8 always divides it; if even
    b=8 overflows the budget (huge planes) we still return 8 and rely on the
    raised vmem limit.
    """
    best = 8
    for d in range(8, nc + 1, 8):
        if nc % d == 0 and d * lane_bytes <= budget_bytes:
            best = d
    return best


def sobel_filter(img, *, block_budget_bytes=1 << 20):
    """img: (N, C, H, W) float32 -> (N, C, H, W) float32 Sobel magnitude."""
    N, C, H, W = img.shape
    nc, hw = N * C, H * W

    # Metadata-only reshape: no halo pad, no layout change.
    x = img.astype(jnp.float32).reshape(nc, hw)

    # Pad sublane axis (nc) to a multiple of 8 and lane axis (hw) to a
    # multiple of 128 so vregs are full and stores are unmasked. At the test
    # shape (nc=8, hw=256) both pads are no-ops.
    nc_p = _round_up(nc, 8)
    hw_p = _round_up(hw, 128)
    if (nc_p, hw_p) != (nc, hw):
        x = jnp.pad(x, ((0, nc_p - nc), (0, hw_p - hw)))

    b = _pick_batch(nc_p, hw_p * 4, block_budget_bytes)
    g = nc_p // b
    x3 = x.reshape(g, b, hw_p)

    # TODO(synk): planes whose single-row batch (8 * H*W * 4B) exceeds ~VMEM
    # budget would need H-axis halo tiling inside a plane; unnecessary here.

    kernel = functools.partial(_sobel_kernel, h=H, w=W,
                               pad_lanes=(hw_p != hw))

    cp_kwargs = dict(dimension_semantics=("parallel",))
    blk = b * hw_p * 4
    scr = b * (hw_p + 2 * W) * 4
    vmem_est = 4 * blk + 2 * scr + (1 << 20)     # dbl-buffered in+out + scratch
    if vmem_est > (16 << 20):                    # only raise past v5e default
        cp_kwargs["vmem_limit_bytes"] = min(vmem_est, 64 << 20)

    out = pl.pallas_call(
        kernel,
        out_shape=jax.ShapeDtypeStruct((g, b, hw_p), jnp.float32),
        grid_spec=pltpu.PrefetchScalarGridSpec(
            num_scalar_prefetch=0,
            grid=(g,),
            in_specs=[pl.BlockSpec((1, b, hw_p), lambda i: (i, 0, 0))],
            out_specs=pl.BlockSpec((1, b, hw_p), lambda i: (i, 0, 0)),
            scratch_shapes=[
                pltpu.VMEM((b, hw_p + 2 * W), jnp.float32),
                pltpu.VMEM((b, hw_p + 2 * W), jnp.float32),
            ],
        ),
        compiler_params=pltpu.CompilerParams(**cp_kwargs),
    )(x3)

    out = out.reshape(nc_p, hw_p)[:nc, :hw]
    return out.reshape(N, C, H, W)


def _sobel_reference(img):
    """Pure-JAX reference (depthwise conv, padding=1, then magnitude)."""
    kx = jnp.array([[-1., 0., 1.], [-2., 0., 2.], [-1., 0., 1.]], jnp.float32)
    ky = jnp.array([[-1., -2., -1.], [0., 0., 0.], [1., 2., 1.]], jnp.float32)
    N, C, H, W = img.shape
    x = img.reshape(N * C, 1, H, W)

    def conv(x, k):
        return jax.lax.conv_general_dilated(
            x, k[None, None, :, :], window_strides=(1, 1),
            padding=((1, 1), (1, 1)),
            dimension_numbers=("NCHW", "OIHW", "NCHW"))

    gx = conv(x, kx)
    gy = conv(x, ky)
    return jnp.sqrt(gx * gx + gy * gy + 1e-6).reshape(N, C, H, W)


if __name__ == "__main__":
    key = jax.random.PRNGKey(0)
    N, C, H, W = 2, 4, 16, 16
    img = jax.random.normal(key, (N, C, H, W), dtype=jnp.float32)

    out = sobel_filter(img)
    out = jax.block_until_ready(out)

    ref = _sobel_reference(img)
    np.testing.assert_allclose(np.asarray(out), np.asarray(ref),
                               rtol=1e-5, atol=1e-5)
    print("KERNEL_OK")
</pallas_src>

<mosaic_0001>
module attributes {stable_mosaic.version = 11 : i64} {
  func.func @_sobel_kernel(%arg0: i32, %arg1: memref<1x8x256xf32, #tpu.memory_space<vmem>>, %arg2: memref<1x8x256xf32, #tpu.memory_space<vmem>>, %arg3: memref<8x288xf32, #tpu.memory_space<vmem>>, %arg4: memref<8x288xf32, #tpu.memory_space<vmem>>) attributes {dimension_semantics = [#tpu.dimension_semantics<parallel>], iteration_bounds = array<i64: 1>, scalar_prefetch = 0 : i64, scratch_operands = 2 : i64, tpu.core_type = #tpu.core_type<tc>, window_params = [{transform_indices = @transform_0, window_bounds = array<i64: 1, 8, 256>}, {transform_indices = @transform_1, window_bounds = array<i64: 1, 8, 256>}]} {
    %c0 = arith.constant 0 : index
    %c0_0 = arith.constant 0 : index
    %c0_1 = arith.constant 0 : index
    %0 = vector.load %arg1[%c0, %c0_0, %c0_1] : memref<1x8x256xf32, #tpu.memory_space<vmem>>, vector<1x8x256xf32>
    %1 = vector.shape_cast %0 : vector<1x8x256xf32> to vector<8x256xf32>
    %2 = tpu.iota {dimensions = array<i32: 1>} : vector<8x256xi32>
    %c15_i32 = arith.constant 15 : i32
    %3 = vector.broadcast %c15_i32 : i32 to vector<8x256xi32>
    %4 = arith.andi %2, %3 : vector<8x256xi32>
    %c0_i32 = arith.constant 0 : i32
    %5 = vector.broadcast %c0_i32 : i32 to vector<8x256xi32>
    %6 = arith.cmpi eq, %4, %5 : vector<8x256xi32>
    %c15_i32_2 = arith.constant 15 : i32
    %7 = vector.broadcast %c15_i32_2 : i32 to vector<8x256xi32>
    %8 = arith.cmpi eq, %4, %7 : vector<8x256xi32>
    %c255_i32 = arith.constant 255 : i32
    %9 = tpu.dynamic_rotate %1 by %c255_i32 dim 1 : vector<8x256xf32>, i32 -> vector<8x256xf32>
    %cst = arith.constant 0.000000e+00 : f32
    %10 = vector.broadcast %cst : f32 to vector<8x256xf32>
    %11 = arith.select %8, %10, %9 : vector<8x256xi1>, vector<8x256xf32>
    %c1_i32 = arith.constant 1 : i32
    %12 = tpu.dynamic_rotate %1 by %c1_i32 dim 1 : vector<8x256xf32>, i32 -> vector<8x256xf32>
    %cst_3 = arith.constant 0.000000e+00 : f32
    %13 = vector.broadcast %cst_3 : f32 to vector<8x256xf32>
    %14 = arith.select %6, %13, %12 : vector<8x256xi1>, vector<8x256xf32>
    %15 = arith.subf %11, %14 : vector<8x256xf32>
    %cst_4 = arith.constant 2.000000e+00 : f32
    %16 = vector.broadcast %cst_4 : f32 to vector<8x256xf32>
    %17 = arith.mulf %16, %1 : vector<8x256xf32>
    %18 = arith.addf %14, %17 : vector<8x256xf32>
    %19 = arith.addf %18, %11 : vector<8x256xf32>
    %c0_i32_5 = arith.constant 0 : i32
    %20 = arith.cmpi eq, %arg0, %c0_i32_5 : i32
    %21 = arith.extui %20 : i1 to i32
    %c0_i32_6 = arith.constant 0 : i32
    %22 = arith.cmpi ne, %21, %c0_i32_6 : i32
    scf.if %22 {
      %cst_22 = arith.constant 0.000000e+00 : f32
      %43 = vector.broadcast %cst_22 : f32 to vector<8x288xf32>
      %c0_23 = arith.constant 0 : index
      %c0_24 = arith.constant 0 : index
      %44 = vector.load %arg3[%c0_23, %c0_24] : memref<8x288xf32, #tpu.memory_space<vmem>>, vector<8x288xf32>
      tpu.vector_store %arg3[%c0_23, %c0_24], %43 {strides = array<i32>} : memref<8x288xf32, #tpu.memory_space<vmem>>, vector<8x288xf32>,
      %cst_25 = arith.constant 0.000000e+00 : f32
      %45 = vector.broadcast %cst_25 : f32 to vector<8x288xf32>
      %c0_26 = arith.constant 0 : index
      %c0_27 = arith.constant 0 : index
      %46 = vector.load %arg4[%c0_26, %c0_27] : memref<8x288xf32, #tpu.memory_space<vmem>>, vector<8x288xf32>
      tpu.vector_store %arg4[%c0_26, %c0_27], %45 {strides = array<i32>} : memref<8x288xf32, #tpu.memory_space<vmem>>, vector<8x288xf32>,
    } else {
    }
    %c0_7 = arith.constant 0 : index
    %c16 = arith.constant 16 : index
    %23 = vector.load %arg3[%c0_7, %c16] : memref<8x288xf32, #tpu.memory_space<vmem>>, vector<8x256xf32>
    tpu.vector_store %arg3[%c0_7, %c16], %15 {strides = array<i32>} : memref<8x288xf32, #tpu.memory_space<vmem>>, vector<8x256xf32>,
    %c0_8 = arith.constant 0 : index
    %c16_9 = arith.constant 16 : index
    %24 = vector.load %arg4[%c0_8, %c16_9] : memref<8x288xf32, #tpu.memory_space<vmem>>, vector<8x256xf32>
    tpu.vector_store %arg4[%c0_8, %c16_9], %19 {strides = array<i32>} : memref<8x288xf32, #tpu.memory_space<vmem>>, vector<8x256xf32>,
    %c0_10 = arith.constant 0 : index
    %c0_11 = arith.constant 0 : index
    %25 = vector.load %arg3[%c0_10, %c0_11] : memref<8x288xf32, #tpu.memory_space<vmem>>, vector<8x256xf32>
    %c0_12 = arith.constant 0 : index
    %c32 = arith.constant 32 : index
    %26 = vector.load %arg3[%c0_12, %c32] : memref<8x288xf32, #tpu.memory_space<vmem>>, vector<8x256xf32>
    %c0_13 = arith.constant 0 : index
    %c0_14 = arith.constant 0 : index
    %27 = vector.load %arg4[%c0_13, %c0_14] : memref<8x288xf32, #tpu.memory_space<vmem>>, vector<8x256xf32>
    %c0_15 = arith.constant 0 : index
    %c32_16 = arith.constant 32 : index
    %28 = vector.load %arg4[%c0_15, %c32_16] : memref<8x288xf32, #tpu.memory_space<vmem>>, vector<8x256xf32>
    %cst_17 = arith.constant 2.000000e+00 : f32
    %29 = vector.broadcast %cst_17 : f32 to vector<8x256xf32>
    %30 = arith.mulf %29, %15 : vector<8x256xf32>
    %31 = arith.addf %25, %30 : vector<8x256xf32>
    %32 = arith.addf %31, %26 : vector<8x256xf32>
    %33 = arith.subf %28, %27 : vector<8x256xf32>
    %34 = arith.mulf %32, %32 : vector<8x256xf32>
    %35 = arith.mulf %33, %33 : vector<8x256xf32>
    %36 = arith.addf %34, %35 : vector<8x256xf32>
    %cst_18 = arith.constant 9.99999997E-7 : f32
    %37 = vector.broadcast %cst_18 : f32 to vector<8x256xf32>
    %38 = arith.addf %36, %37 : vector<8x256xf32>
    %39 = math.sqrt %38 : vector<8x256xf32>
    %c0_19 = arith.constant 0 : index
    %c0_20 = arith.constant 0 : index
    %c0_21 = arith.constant 0 : index
    %40 = vector.load %arg2[%c0_19, %c0_20, %c0_21] : memref<1x8x256xf32, #tpu.memory_space<vmem>>, vector<1x8x256xf32>
    %41 = vector.shape_cast %40 : vector<1x8x256xf32> to vector<8x256xf32>
    %42 = vector.shape_cast %39 : vector<8x256xf32> to vector<1x8x256xf32>
    tpu.vector_store %arg2[%c0_19, %c0_20, %c0_21], %42 {strides = array<i32>} : memref<1x8x256xf32, #tpu.memory_space<vmem>>, vector<1x8x256xf32>,
    return
  }
  func.func @transform_0(%arg0: i32) -> (i32, i32, i32) {
    %c0_i32 = arith.constant 0 : i32
    %c0_i32_0 = arith.constant 0 : i32
    %c0_i32_1 = arith.constant 0 : i32
    return %arg0, %c0_i32, %c0_i32_0 : i32, i32, i32
  }
  func.func @transform_1(%arg0: i32) -> (i32, i32, i32) {
    %c0_i32 = arith.constant 0 : i32
    %c0_i32_0 = arith.constant 0 : i32
    %c0_i32_1 = arith.constant 0 : i32
    return %arg0, %c0_i32, %c0_i32_0 : i32, i32, i32
  }
}

</mosaic_0001>

<bundles_post_ra>
// kernel: tpu_custom_call.1
= control target key start
LH: loop header
LB: loop body
LE: loop exit
PB: predicated region body
PF: predicated region fallthrough
CT: control target
= control target key end

     0   :  { %6 = vsyncpa [#allocation5], 0  ;;  %s273_s0 = inlined_call_operand.hbm [shape: f32[1,8,256], index: 0, kind: input, shape index: {}]   ;;  %s274_s1 = inlined_call_operand.hbm [shape: f32[1,8,256], index: 1, kind: output, shape index: {}]  }
   0x1   :  { %7 = vsyncpa [#allocation6], 0  ;;  %s246_s6 = smov [#allocation4]  }
   0x2   :  { %s14_s7 = sshll.u32 %s246_s6, 4  ;;  %s15_s7 = int_to_ptr.vmem [resolvable:$true] %s14_s7 }
   0x3   :  { %s210_s8 = scalar_lea.vmem %s15_s7, 256  ;;  %p215_p1 = scmp.lt.s32.totalorder %s15_s7, %s15_s7 }
   0x4   :  { %p211_p0 = scmp.ne.s32.totalorder %s15_s7, %s210_s8  ;;  %p216_p2 = scmp.lt.s32.totalorder %s210_s8, %s210_s8 }
   0x6   :  { %p217_p3 = por %p216_p2, %p215_p1 }
   0x8   :  { %p218_p4 = pnand %p217_p3, %p211_p0 }
   0xa   :  { %221 = shalt.err (!%p218_p4)
}
   0xb   :  { %17 = dma.hbm_to_vmem [thread:$0]  %s273_s0, 256, %s15_s7, [#allocation5]  }
   0xc   :  { %242 = dma.done.wait [#allocation5], 256  }
   0xd   :  { %243 = vsyncadd [#allocation5], 4294967040  ;;  %v21_v0 = vld [vmem:[#allocation4] sm:$0xff]  ;;  %s247_s11 = smov 127   ;;  %s248_s12 = smov 1   ;;  %v22_v1 = vld [vmem:[#allocation4 + $0x8] sm:$0xff]  ;;  %v23_v3 = vlaneseq }
   0xe   :  { %32 = vrot.lane.b32.xlu1 %v21_v0, %s247_s11  ;;  %41 = vrot.lane.b32.xlu0 %v21_v0, %s248_s12  ;;  %vm64_vm0 = vcmask 261120   ;;  %v249_v2 = vmov 0.0   ;;  %v52_v10 = vmul.f32 2.0, %v21_v0  ;;  %v53_v11 = vmul.f32 2.0, %v22_v1  ;;  %s250_s0 = smov 16   ;;  %s251_s13 = smov 32  }
   0xf   :  { %68 = vst.msk [vmem:[#allocation3 + $0x10] sm:$0xff] %vm64_vm0, %v249_v2  ;;  %62 = vst [vmem:[#allocation2] sm:$0xff] %v249_v2  ;;  %v24_v4 = vand.u32 127, %v23_v3  ;;  %vm75_vm7 = vcmask 130048   ;;  %vm80_vm8 = vcmask 1047680   ;;  %s252_s14 = smov 96  }
  0x10   :  { %65 = vst.msk [vmem:[#allocation2 + $0x10] sm:$0xff] %vm64_vm0, %v249_v2  ;;  %66 = vst [vmem:[#allocation3] sm:$0xff] %v249_v2  ;;  %vm116_vm9 = vcmask 785408   ;;  %s253_s15 = smov [#allocation7]  }
  0x11   :  { %v25_v5 = vadd.s32 128, %v24_v4  ;;  %v26_v6 = vand.u32 15, %v24_v4  ;;  %vm36_vm1 = vcmp.lt.s32.totalorder %v24_v4, 127  ;;  %vm45_vm2 = vcmp.lt.s32.totalorder %v24_v4, 1  ;;  %s181_s16 = sshll.u32 %s253_s15, 4  ;;  %s182_s16 = int_to_ptr.vmem [resolvable:$true] %s181_s16 }
  0x12   :  { %34 = vrot.lane.b32.xlu1 %v22_v1, %s247_s11  ;;  %43 = vrot.lane.b32.xlu0 %v22_v1, %s248_s12  ;;  %s222_s17 = scalar_lea.vmem %s182_s16, 256  ;;  %p227_p6 = scmp.lt.s32.totalorder %s182_s16, %s182_s16 }
  0x13   :  { %v27_v7 = vand.u32 15, %v25_v5  ;;  %vm28_vm3 = vcmp.eq.s32.totalorder %v26_v6, 0  ;;  %vm30_vm5 = vcmp.eq.s32.totalorder %v26_v6, 15  ;;  %p223_p5 = scmp.ne.s32.totalorder %s182_s16, %s222_s17  ;;  %p228_p7 = scmp.lt.s32.totalorder %s222_s17, %s222_s17 }
  0x15   :  { %vm29_vm4 = vcmp.eq.s32.totalorder %v27_v7, 0  ;;  %vm31_vm6 = vcmp.eq.s32.totalorder %v27_v7, 15  ;;  %p229_p8 = por %p228_p7, %p227_p6 }
  0x17   :  { %p230_p9 = pnand %p229_p8, %p223_p5 }
  0x80   :  { %v33_v8 = vpop.permute.xlu1 %32  ;;  %v42_v9 = vpop.permute.xlu0 %41 }
  0x84   :  { %v35_v12 = vpop.permute.xlu1 %34  ;;  %v44_v13 = vpop.permute.xlu0 %43 }
  0x85   :  { %v37_v14 = vsel %vm36_vm1, %v33_v8, %v35_v12  ;;  %v38_v15 = vsel %vm36_vm1, %v35_v12, %v33_v8  ;;  %v46_v16 = vsel %vm45_vm2, %v42_v9, %v44_v13  ;;  %v47_v17 = vsel %vm45_vm2, %v44_v13, %v42_v9 }
  0x86   :  { %v48_v18 = vsel %vm28_vm3, 0.0, %v47_v17  ;;  %v49_v19 = vsel %vm29_vm4, 0.0, %v46_v16  ;;  %v39_v22 = vsel %vm30_vm5, 0.0, %v37_v14  ;;  %v40_v23 = vsel %vm31_vm6, 0.0, %v38_v15 }
  0x87   :  { %v54_v20 = vadd.f32 %v52_v10, %v48_v18  ;;  %v55_v21 = vadd.f32 %v53_v11, %v49_v19  ;;  %v50_v26 = vsub.f32 %v39_v22, %v48_v18  ;;  %v51_v27 = vsub.f32 %v40_v23, %v49_v19 }
  0x89   :  { %v57_v24 = vadd.f32 %v55_v21, %v40_v23  ;;  %v56_v25 = vadd.f32 %v54_v20, %v39_v22  ;;  %v104_v33 = vmul.f32 2.0, %v51_v27  ;;  %v103_v37 = vmul.f32 2.0, %v50_v26 }
  0x8b   :  { %88 = vrot.lane.b32.xlu1 %v57_v24, %s250_s0  ;;  %86 = vrot.lane.b32.xlu0 %v56_v25, %s250_s0 }
  0x8f   :  { %73 = vrot.lane.b32.xlu1 %v51_v27, %s250_s0  ;;  %71 = vrot.lane.b32.xlu0 %v50_v26, %s250_s0 }
  0xfd   :  { %v89_v28 = vpop.permute.xlu1 %88  ;;  %v87_v29 = vpop.permute.xlu0 %86 }
  0xfe   :  { %96 = vst.msk [vmem:[#allocation3 + $0x10] sm:$0xff] %vm75_vm7, %v89_v28  ;;  %v90_v30 = vsel %vm75_vm7, %v87_v29, %v89_v28 }
  0xff   :  { %94 = vst.msk [vmem:[#allocation3] sm:$0xff] %vm80_vm8, %v87_v29  ;;  %127 = vrot.lane.b32.xlu1 %v90_v30, %s251_s13 }
 0x101   :  { %v74_v31 = vpop.permute.xlu1 %73  ;;  %v72_v32 = vpop.permute.xlu0 %71 }
 0x102   :  { %83 = vst.msk [vmem:[#allocation2 + $0x10] sm:$0xff] %vm75_vm7, %v74_v31  ;;  %v76_v34 = vsel %vm75_vm7, %v72_v32, %v74_v31 }
 0x103   :  { %81 = vst.msk [vmem:[#allocation2] sm:$0xff] %vm80_vm8, %v72_v32  ;;  %112 = vrot.lane.b32.xlu1 %v76_v34, %s252_s14  ;;  %v106_v35 = vadd.f32 %v104_v33, %v76_v34 }
 0x105   :  { %v102_v45 = vld [vmem:[#allocation3 + $0x10] sm:$0xff] }
 0x106   :  { %v100_v36 = vld [vmem:[#allocation3] sm:$0xff] }
 0x107   :  { %125 = vrot.lane.b32.xlu0 %v100_v36, %s251_s13 }
 0x109   :  { %v99_v40 = vld [vmem:[#allocation2 + $0x10] sm:$0xff] }
 0x10a   :  { %v97_v38 = vld [vmem:[#allocation2] sm:$0xff] }
 0x10b   :  { %110 = vrot.lane.b32.xlu0 %v97_v38, %s252_s14  ;;  %v105_v39 = vadd.f32 %v103_v37, %v97_v38 }
 0x10f   :  { %114 = vrot.lane.b32.xlu0 %v99_v40, %s252_s14 }
 0x171   :  { %v128_v42 = vpop.permute.xlu1 %127 }
 0x172   :  { %v136_v48 = vsub.f32 %v102_v45, %v128_v42 }
 0x174   :  { %v141_v50 = vmul.f32 %v136_v48, %v136_v48 }
 0x175   :  { %v113_v52 = vpop.permute.xlu1 %112 }
 0x179   :  { %v126_v41 = vpop.permute.xlu0 %125 }
 0x17a   :  { %v134_v43 = vsub.f32 %v100_v36, %v126_v41  ;;  %v130_v44 = vsel %vm64_vm0, %v126_v41, %v128_v42 }
 0x17b   :  { %v135_v46 = vsub.f32 %v90_v30, %v130_v44 }
 0x17c   :  { %v139_v47 = vmul.f32 %v134_v43, %v134_v43 }
 0x17d   :  { %v140_v49 = vmul.f32 %v135_v46, %v135_v46  ;;  %v111_v51 = vpop.permute.xlu0 %110 }
 0x17e   :  { %145 = vrot.lane.b32.xlu1 %v139_v47, %s252_s14  ;;  %v117_v53 = vsel %vm116_vm9, %v111_v51, %v113_v52 }
 0x17f   :  { %147 = vrot.lane.b32.xlu0 %v140_v49, %s252_s14  ;;  %v121_v55 = vadd.f32 %v117_v53, %v105_v39 }
 0x181   :  { %v115_v54 = vpop.permute.xlu0 %114  ;;  %v137_v59 = vmul.f32 %v121_v55, %v121_v55 }
 0x182   :  { %149 = vrot.lane.b32.xlu1 %v141_v50, %s252_s14  ;;  %v118_v56 = vsel %vm116_vm9, %v113_v52, %v115_v54 }
 0x183   :  { %v122_v57 = vadd.f32 %v118_v56, %v106_v35 }
 0x185   :  { %v138_v63 = vmul.f32 %v122_v57, %v122_v57 }
 0x1f0   :  { %v146_v58 = vpop.permute.xlu1 %145 }
 0x1f1   :  { %v148_v60 = vpop.permute.xlu0 %147 }
 0x1f2   :  { %v151_v61 = vsel %vm116_vm9, %v146_v58, %v148_v60 }
 0x1f3   :  { %v155_v62 = vadd.f32 %v151_v61, %v137_v59 }
 0x1f4   :  { %v150_v0 = vpop.permute.xlu1 %149 }
 0x1f5   :  { %v157_v1 = vadd.f32 1e-06, %v155_v62  ;;  %v152_v2 = vsel %vm116_vm9, %v148_v60, %v150_v0 }
 0x1f6   :  { %v156_v3 = vadd.f32 %v152_v2, %v138_v63 }
 0x1f7   :  { %198 = vrsqrt.f32 %v157_v1  ;;  %vm161_vm10 = vcmp.eq.f32.partialorder %v157_v1, inf  ;;  %v164_v7 = vand.u32 2147483648, %v157_v1  ;;  %vm163_vm11 = vcmp.eq.f32.partialorder %v157_v1, 0.0 }
 0x1f8   :  { %v158_v4 = vadd.f32 1e-06, %v156_v3 }
 0x1fa   :  { %200 = vrsqrt.f32 %v158_v4  ;;  %vm168_vm12 = vcmp.eq.f32.partialorder %v158_v4, inf  ;;  %v171_v12 = vand.u32 2147483648, %v158_v4  ;;  %vm170_vm13 = vcmp.eq.f32.partialorder %v158_v4, 0.0 }
 0x204   :  { %v199_v5 = vpop.eup %198 }
 0x205   :  { %v160_v6 = vmul.f32 %v199_v5, %v157_v1 }
 0x207   :  { %v201_v8 = vpop.eup %200  ;;  %v162_v9 = vsel %vm161_vm10, %v157_v1, %v160_v6 }
 0x208   :  { %v165_v10 = vsel %vm163_vm11, %v164_v7, %v162_v9  ;;  %v167_v11 = vmul.f32 %v201_v8, %v158_v4 }
 0x209   :  { %173 = vst [vmem:[#allocation7] sm:$0xff] %v165_v10 }
 0x20a   :  { %v169_v13 = vsel %vm168_vm12, %v158_v4, %v167_v11 }
 0x20b   :  { %v172_v14 = vsel %vm170_vm13, %v171_v12, %v169_v13 }
 0x20c   :  { %174 = vst [vmem:[#allocation7 + $0x8] sm:$0xff] %v172_v14 }
 0x20d   :  { %233 = shalt.err (!%p230_p9)
}
 0x20e   :  { %184 = dma.vmem_to_hbm [thread:$0]  %s182_s16, 256, %s274_s1, [#allocation6]  }
 0x20f   :  { %244 = dma.done.wait [#allocation6], 256  }
 0x210   :  { %245 = vsyncadd [#allocation6], 4294967040 }
 0x211   :  { %188 = vsyncpa [#allocation5], 1 }
 0x212   :  { %189 = vsyncpa [#allocation6], 1 }

</bundles_post_ra>
